<compile_context>
chip_gen: v7x
topology: tpu7x:2x2x1
jax: 0.10.0
libtpu: 0.0.40
codegen_flags: <defaults>
</compile_context>

<pallas_src>
import functools

import jax
import jax.numpy as jnp
from jax.experimental import pallas as pl
from jax.experimental.pallas import tpu as pltpu

KH, KW = 4, 4
STRIDE = 2
EPS = 1e-5          # InstanceNorm2d default eps
NEG_SLOPE = 0.2     # LeakyReLU slope
LANE = 128


# --------------------------------------------------------------------------------------
# Pass 1: conv matmul + per-channel (mean, M2) accumulation, raw y streamed to HBM.
# --------------------------------------------------------------------------------------
def _conv_stats_kernel(p_ref, w_ref, y_ref, mean_ref, scale_ref,
                       mean_acc, m2_acc, *, p_total, tile_p, needs_mask):
    pt = pl.program_id(2)

    @pl.when(pt == 0)
    def _():
        mean_acc[...] = jnp.zeros_like(mean_acc)
        m2_acc[...] = jnp.zeros_like(m2_acc)

    patches = p_ref[0]                                   # (K, Pt)
    w = w_ref[...]                                       # (tc, K)
    # Single folded-K MXU matmul (K = 16*Cin), f32 accumulation. K is NOT padded to the
    # MXU depth: small-Cin layers are HBM-bound, padding would only add real work.
    y = jnp.dot(w, patches, preferred_element_type=jnp.float32)   # (tc, Pt) f32

    # Raw conv output streamed to HBM (normalized in place by pass 2).
    y_ref[0] = y.astype(y_ref.dtype)

    # ---- per-tile centered statistics (padded lanes masked out of M2) ----
    sum_b = jnp.sum(y, axis=-1, keepdims=True)           # padded patch columns give y == 0
    if needs_mask:
        valid_i = jnp.minimum(tile_p, p_total - pt * tile_p)      # int32 scalar
        n_b = valid_i.astype(jnp.float32)
        mean_b = sum_b / n_b
        lane = jax.lax.broadcasted_iota(jnp.int32, y.shape, 1)
        centered = jnp.where(lane < valid_i, y - mean_b, 0.0)
    else:
        n_b = jnp.float32(tile_p)
        mean_b = sum_b / n_b
        centered = y - mean_b
    m2_b = jnp.sum(centered * centered, axis=-1, keepdims=True)

    # ---- Chan/Welford parallel combination with the running stats ----
    n_a = (pt * tile_p).astype(jnp.float32)
    n_ab = n_a + n_b
    mean_a = mean_acc[...]
    delta = mean_b - mean_a
    mean_acc[...] = mean_a + delta * (n_b / n_ab)
    m2_acc[...] = m2_acc[...] + m2_b + delta * delta * (n_a * n_b / n_ab)

    @pl.when(pt == pl.num_programs(2) - 1)
    def _():
        var = m2_acc[...] * (1.0 / p_total)              # biased variance (PyTorch IN)
        inv1 = jax.lax.rsqrt(var + EPS)                  # first InstanceNorm (EUP rsqrt)
        var1 = var * (inv1 * inv1)                       # variance after the first norm
        scale = inv1 * jax.lax.rsqrt(var1 + EPS)         # fused scale of both stacked norms
        mean_ref[0] = mean_acc[...]
        scale_ref[0] = scale


# --------------------------------------------------------------------------------------
# Pass 2: (y - mean) * fused_scale, LeakyReLU(0.2); writes in place over y.
# --------------------------------------------------------------------------------------
def _norm_act_kernel(y_ref, mean_ref, scale_ref, o_ref):
    y = y_ref[0].astype(jnp.float32)                     # (tc, Pt)
    yn = (y - mean_ref[0]) * scale_ref[0]                # (tc, 1) broadcasts over lanes
    o_ref[0] = jnp.where(yn >= 0.0, yn, NEG_SLOPE * yn).astype(o_ref.dtype)


# --------------------------------------------------------------------------------------
# XLA-side glue + tiling heuristics
# --------------------------------------------------------------------------------------
def _im2col(x):
    """(N, Cin, H, W) -> (N, 16*Cin, OH*OW) patches of the 4x4 / stride-2 / pad-1 conv."""
    n, c_in, h, w = x.shape
    oh, ow = h // STRIDE, w // STRIDE
    x_pad = jnp.pad(x, ((0, 0), (0, 0), (1, 1), (1, 1)))
    taps = []
    for kh in range(KH):
        for kw in range(KW):
            taps.append(jax.lax.slice(
                x_pad,
                (0, 0, kh, kw),
                (n, c_in, kh + STRIDE * (oh - 1) + 1, kw + STRIDE * (ow - 1) + 1),
                (1, 1, STRIDE, STRIDE)))                 # (N, Cin, OH, OW)
    patches = jnp.stack(taps, axis=1)                    # (N, 16, Cin, OH, OW)
    return patches.reshape(n, KH * KW * c_in, oh * ow)


def _pick_cout_tile(c_out):
    # <=128 so Cout//tc >= 2 once Cout >= 256 (keeps both v7x TensorCores fed);
    # prefer multiples of 16 so bf16-packed (tc, K) / (tc, P) tiles sit on full sublanes.
    for t in (128, 64, 32, 16):
        if c_out % t == 0:
            return t
    return 8 if c_out % 8 == 0 else c_out


def _pick_spatial_tile(p_pad, k, in_item, tc, out_item):
    """Largest multiple-of-128 divisor of p_pad that fits the per-block byte budgets."""
    patch_budget = 6 << 20      # (1, K, Pt) streaming operand
    out_budget = 4 << 20        # (1, tc, Pt) y / output block
    best = LANE
    t = LANE
    while t <= min(p_pad, 8192):
        if (p_pad % t == 0 and k * t * in_item <= patch_budget
                and tc * t * out_item <= out_budget):
            best = t
        t += LANE
    return best


def _vmem_limit_bytes(k, tp, tc, in_item, out_item):
    # Per-step footprint: double-buffered patch / y blocks + weights + f32 y temp + slack.
    est = (2 * k * tp * in_item + 2 * tc * tp * out_item + 2 * tc * k * in_item
           + tc * tp * 4 + (2 << 20))
    # ~2x headroom; >=32 MiB lifts v5e's small scoped default, <=96 MiB (fine on 128 MiB
    # v5e/v6e; on v7x the actual usage stays far below the 64 MiB physical VMEM).
    return int(min(max(2 * est, 32 << 20), 96 << 20))


@functools.partial(jax.jit, static_argnames=("mxu_dtype",))
def down_forward(x, w, *, mxu_dtype=jnp.bfloat16):
    """x: (N, Cin, H, W), w: (Cout, Cin, 4, 4) -> LeakyReLU(IN(IN(conv(x)))) as (N, Cout, H/2, W/2).

    mxu_dtype: dtype of the MXU operands (bf16 by default — the op is HBM-bound on
    v6e/v7x; pass jnp.float32 for a full-precision path). Accumulation, statistics and
    the normalization math are always f32; the output dtype matches x.dtype.
    """
    n, c_in, h, wid = x.shape
    c_out = w.shape[0]
    oh, ow = h // STRIDE, wid // STRIDE
    p = oh * ow
    p_pad = -(-p // LANE) * LANE
    k = KH * KW * c_in
    out_dtype = x.dtype

    # ---- glue (XLA): cast first (halves im2col traffic for bf16), tap gather, pad ----
    if mxu_dtype is not None and jnp.dtype(mxu_dtype) != x.dtype:
        x_in, w_in = x.astype(mxu_dtype), w.astype(mxu_dtype)
    else:
        x_in, w_in = x, w
    patches = _im2col(x_in)                                       # (N, K, P)
    if p_pad != p:
        patches = jnp.pad(patches, ((0, 0), (0, 0), (0, p_pad - p)))
    w_mat = jnp.transpose(w_in, (0, 2, 3, 1)).reshape(c_out, k)   # K ordered (kh, kw, cin)

    in_item = patches.dtype.itemsize
    out_item = jnp.dtype(out_dtype).itemsize
    tc = _pick_cout_tile(c_out)
    tp = _pick_spatial_tile(p_pad, k, in_item, tc, out_item)
    grid = (n, c_out // tc, p_pad // tp)
    vmem_limit = _vmem_limit_bytes(k, tp, tc, in_item, out_item)

    # ---- pass 1: conv matmul + per-channel stats, raw y streamed to HBM ----
    y, mean, scale = pl.pallas_call(
        functools.partial(_conv_stats_kernel, p_total=p, tile_p=tp,
                          needs_mask=(p_pad != p)),
        out_shape=(
            jax.ShapeDtypeStruct((n, c_out, p_pad), out_dtype),
            jax.ShapeDtypeStruct((n, c_out, 1), jnp.float32),
            jax.ShapeDtypeStruct((n, c_out, 1), jnp.float32),
        ),
        grid_spec=pltpu.PrefetchScalarGridSpec(
            num_scalar_prefetch=0,
            grid=grid,
            in_specs=[
                pl.BlockSpec((1, k, tp), lambda b, j, s: (b, 0, s)),
                # Weight block index is constant over the innermost P axis -> one DMA per
                # (image, Cout tile), not per grid step.
                pl.BlockSpec((tc, k), lambda b, j, s: (j, 0)),
            ],
            out_specs=[
                pl.BlockSpec((1, tc, tp), lambda b, j, s: (b, j, s)),
                pl.BlockSpec((1, tc, 1), lambda b, j, s: (b, j, 0)),
                pl.BlockSpec((1, tc, 1), lambda b, j, s: (b, j, 0)),
            ],
            scratch_shapes=[pltpu.VMEM((tc, 1), jnp.float32),
                            pltpu.VMEM((tc, 1), jnp.float32)],
        ),
        compiler_params=pltpu.CompilerParams(
            dimension_semantics=("parallel", "parallel", "arbitrary"),
            vmem_limit_bytes=vmem_limit),
        cost_estimate=pl.CostEstimate(
            flops=2 * n * c_out * k * p_pad,
            transcendentals=2 * n * c_out,
            bytes_accessed=(patches.size * in_item + n * w_mat.size * in_item
                            + n * c_out * p_pad * out_item)),
    )(patches, w_mat)

    # ---- pass 2: (y - mean) * scale + LeakyReLU, written in place over y ----
    out = pl.pallas_call(
        _norm_act_kernel,
        out_shape=jax.ShapeDtypeStruct((n, c_out, p_pad), out_dtype),
        grid_spec=pltpu.PrefetchScalarGridSpec(
            num_scalar_prefetch=0,
            grid=grid,
            in_specs=[
                pl.BlockSpec((1, tc, tp), lambda b, j, s: (b, j, s)),
                pl.BlockSpec((1, tc, 1), lambda b, j, s: (b, j, 0)),
                pl.BlockSpec((1, tc, 1), lambda b, j, s: (b, j, 0)),
            ],
            out_specs=pl.BlockSpec((1, tc, tp), lambda b, j, s: (b, j, s)),
        ),
        input_output_aliases={0: 0},      # normalize y in place (no extra HBM buffer)
        compiler_params=pltpu.CompilerParams(
            dimension_semantics=("parallel", "parallel", "parallel"),
            vmem_limit_bytes=vmem_limit),
        cost_estimate=pl.CostEstimate(
            flops=3 * n * c_out * p_pad,
            transcendentals=0,
            bytes_accessed=2 * n * c_out * p_pad * out_item),
    )(y, mean, scale)

    # Drop the lane padding (those positions hold junk after the normalization) and
    # restore NCHW. When OH*OW is already a multiple of 128 the reshape is free.
    if p_pad != p:
        out = out[:, :, :p]
    return out.reshape(n, c_out, oh, ow)


# --------------------------------------------------------------------------------------
# Reference & self-check
# --------------------------------------------------------------------------------------
def _reference(x, w):
    """Plain-JAX reference with PyTorch semantics (conv -> IN -> IN -> LeakyReLU)."""
    y = jax.lax.conv_general_dilated(
        x, w, window_strides=(STRIDE, STRIDE), padding=((1, 1), (1, 1)),
        dimension_numbers=("NCHW", "OIHW", "NCHW"))

    def inorm(z):
        mu = jnp.mean(z, axis=(2, 3), keepdims=True)
        var = jnp.mean((z - mu) ** 2, axis=(2, 3), keepdims=True)
        return (z - mu) * jax.lax.rsqrt(var + EPS)

    y = inorm(inorm(y))
    return jnp.where(y >= 0, y, NEG_SLOPE * y)


if __name__ == "__main__":
    N, C_IN, C_OUT, H, W = 2, 4, 8, 16, 16

    key = jax.random.PRNGKey(0)
    kx, kw = jax.random.split(key)
    x = jax.random.normal(kx, (N, C_IN, H, W), dtype=jnp.float32)
    # Same shape as nn.Conv2d(in, out, 4).weight
    w = jax.random.normal(kw, (C_OUT, C_IN, KH, KW), dtype=jnp.float32) * 0.05

    ref = _reference(x, w)

    # Full-precision MXU path: tight check against the reference.
    out_f32 = jax.block_until_ready(down_forward(x, w, mxu_dtype=jnp.float32))
    assert out_f32.shape == (N, C_OUT, H // 2, W // 2), out_f32.shape
    err_f32 = float(jnp.max(jnp.abs(out_f32 - ref)))
    assert jnp.allclose(out_f32, ref, atol=5e-4, rtol=5e-4), err_f32

    # Default bf16-MXU path (v5e/v6e/v7x throughput mode): loose-tolerance check — the
    # normalization is scale-invariant, so layout/packing bugs would show far above this.
    out_bf16 = jax.block_until_ready(down_forward(x, w))
    assert out_bf16.shape == out_f32.shape
    err_bf16 = float(jnp.max(jnp.abs(out_bf16 - ref)))
    assert jnp.allclose(out_bf16, ref, atol=5e-2, rtol=5e-2), err_bf16

    print("KERNEL_OK")
</pallas_src>

<mosaic_0001>
module attributes {stable_mosaic.version = 11 : i64} {
  func.func @_conv_stats_kernel(%arg0: i32, %arg1: i32, %arg2: i32, %arg3: memref<1x64x128xf32, #tpu.memory_space<vmem>>, %arg4: memref<8x64xf32, #tpu.memory_space<vmem>>, %arg5: memref<1x8x128xf32, #tpu.memory_space<vmem>>, %arg6: memref<1x8x1xf32, #tpu.memory_space<vmem>>, %arg7: memref<1x8x1xf32, #tpu.memory_space<vmem>>, %arg8: memref<8x1xf32, #tpu.memory_space<vmem>>, %arg9: memref<8x1xf32, #tpu.memory_space<vmem>>) attributes {dimension_semantics = [#tpu.dimension_semantics<parallel>, #tpu.dimension_semantics<parallel>, #tpu.dimension_semantics<arbitrary>], iteration_bounds = array<i64: 2, 1, 1>, scalar_prefetch = 0 : i64, scratch_operands = 2 : i64, tpu.core_type = #tpu.core_type<tc>, window_params = [{transform_indices = @transform_0, window_bounds = array<i64: 1, 64, 128>}, {transform_indices = @transform_1, window_bounds = array<i64: 8, 64>}, {transform_indices = @transform_2, window_bounds = array<i64: 1, 8, 128>}, {transform_indices = @transform_3, window_bounds = array<i64: 1, 8, 1>}, {transform_indices = @transform_4, window_bounds = array<i64: 1, 8, 1>}]} {
    %c0_i32 = arith.constant 0 : i32
    %0 = arith.cmpi eq, %arg2, %c0_i32 : i32
    %1 = arith.extui %0 : i1 to i32
    %c0_i32_0 = arith.constant 0 : i32
    %2 = arith.cmpi ne, %1, %c0_i32_0 : i32
    scf.if %2 {
      %cst_23 = arith.constant 0.000000e+00 : f32
      %50 = vector.broadcast %cst_23 : f32 to vector<8x1xf32>
      %c0_24 = arith.constant 0 : index
      %c0_25 = arith.constant 0 : index
      %51 = vector.load %arg8[%c0_24, %c0_25] : memref<8x1xf32, #tpu.memory_space<vmem>>, vector<8x1xf32>
      tpu.vector_store %arg8[%c0_24, %c0_25], %50 {strides = array<i32>} : memref<8x1xf32, #tpu.memory_space<vmem>>, vector<8x1xf32>,
      %cst_26 = arith.constant 0.000000e+00 : f32
      %52 = vector.broadcast %cst_26 : f32 to vector<8x1xf32>
      %c0_27 = arith.constant 0 : index
      %c0_28 = arith.constant 0 : index
      %53 = vector.load %arg9[%c0_27, %c0_28] : memref<8x1xf32, #tpu.memory_space<vmem>>, vector<8x1xf32>
      tpu.vector_store %arg9[%c0_27, %c0_28], %52 {strides = array<i32>} : memref<8x1xf32, #tpu.memory_space<vmem>>, vector<8x1xf32>,
    } else {
    }
    %c0 = arith.constant 0 : index
    %c0_1 = arith.constant 0 : index
    %c0_2 = arith.constant 0 : index
    %3 = vector.load %arg3[%c0, %c0_1, %c0_2] : memref<1x64x128xf32, #tpu.memory_space<vmem>>, vector<1x64x128xf32>
    %4 = vector.shape_cast %3 : vector<1x64x128xf32> to vector<64x128xf32>
    %c0_3 = arith.constant 0 : index
    %c0_4 = arith.constant 0 : index
    %5 = vector.load %arg4[%c0_3, %c0_4] : memref<8x64xf32, #tpu.memory_space<vmem>>, vector<8x64xf32>
    %cst = arith.constant dense<0.000000e+00> : vector<8x128xf32>
    %6 = tpu.matmul %5, %4, %cst {dimension_numbers = #tpu.dot_dimension_numbers<[1], [0], [0], [1], [0, 0, 1, 1], [], []>} : vector<8x64xf32>, vector<64x128xf32>, vector<8x128xf32> -> vector<8x128xf32>
    %c0_5 = arith.constant 0 : index
    %c0_6 = arith.constant 0 : index
    %c0_7 = arith.constant 0 : index
    %7 = vector.load %arg5[%c0_5, %c0_6, %c0_7] : memref<1x8x128xf32, #tpu.memory_space<vmem>>, vector<1x8x128xf32>
    %8 = vector.shape_cast %7 : vector<1x8x128xf32> to vector<8x128xf32>
    %9 = vector.shape_cast %6 : vector<8x128xf32> to vector<1x8x128xf32>
    tpu.vector_store %arg5[%c0_5, %c0_6, %c0_7], %9 {strides = array<i32>} : memref<1x8x128xf32, #tpu.memory_space<vmem>>, vector<1x8x128xf32>,
    %cst_8 = arith.constant dense<0.000000e+00> : vector<8xf32>
    %10 = vector.multi_reduction <add>, %6, %cst_8 [1] : vector<8x128xf32> to vector<8xf32>
    %11 = vector.shape_cast %10 : vector<8xf32> to vector<8x1xf32>
    %c128_i32 = arith.constant 128 : i32
    %12 = arith.muli %arg2, %c128_i32 : i32
    %c64_i32 = arith.constant 64 : i32
    %13 = arith.subi %c64_i32, %12 : i32
    %c128_i32_9 = arith.constant 128 : i32
    %14 = arith.minsi %c128_i32_9, %13 : i32
    %15 = arith.sitofp %14 : i32 to f32
    %16 = vector.broadcast %15 : f32 to vector<8x1xf32>
    %17 = arith.divf %11, %16 : vector<8x1xf32>
    %18 = tpu.iota {dimensions = array<i32: 1>} : vector<8x128xi32>
    %19 = vector.broadcast %14 : i32 to vector<8x128xi32>
    %20 = arith.cmpi slt, %18, %19 : vector<8x128xi32>
    %21 = vector.broadcast %17 : vector<8x1xf32> to vector<8x128xf32>
    %22 = arith.subf %6, %21 : vector<8x128xf32>
    %cst_10 = arith.constant 0.000000e+00 : f32
    %23 = vector.broadcast %cst_10 : f32 to vector<8x128xf32>
    %24 = arith.select %20, %22, %23 : vector<8x128xi1>, vector<8x128xf32>
    %25 = arith.mulf %24, %24 : vector<8x128xf32>
    %cst_11 = arith.constant dense<0.000000e+00> : vector<8xf32>
    %26 = vector.multi_reduction <add>, %25, %cst_11 [1] : vector<8x128xf32> to vector<8xf32>
    %27 = vector.shape_cast %26 : vector<8xf32> to vector<8x1xf32>
    %c128_i32_12 = arith.constant 128 : i32
    %28 = arith.muli %arg2, %c128_i32_12 : i32
    %29 = arith.sitofp %28 : i32 to f32
    %30 = arith.addf %29, %15 : f32
    %c0_13 = arith.constant 0 : index
    %c0_14 = arith.constant 0 : index
    %31 = vector.load %arg8[%c0_13, %c0_14] : memref<8x1xf32, #tpu.memory_space<vmem>>, vector<8x1xf32>
    %32 = arith.subf %17, %31 : vector<8x1xf32>
    %33 = arith.divf %15, %30 : f32
    %34 = vector.broadcast %33 : f32 to vector<8x1xf32>
    %35 = arith.mulf %32, %34 : vector<8x1xf32>
    %36 = arith.addf %31, %35 : vector<8x1xf32>
    %c0_15 = arith.constant 0 : index
    %c0_16 = arith.constant 0 : index
    %37 = vector.load %arg8[%c0_15, %c0_16] : memref<8x1xf32, #tpu.memory_space<vmem>>, vector<8x1xf32>
    tpu.vector_store %arg8[%c0_15, %c0_16], %36 {strides = array<i32>} : memref<8x1xf32, #tpu.memory_space<vmem>>, vector<8x1xf32>,
    %c0_17 = arith.constant 0 : index
    %c0_18 = arith.constant 0 : index
    %38 = vector.load %arg9[%c0_17, %c0_18] : memref<8x1xf32, #tpu.memory_space<vmem>>, vector<8x1xf32>
    %39 = arith.addf %38, %27 : vector<8x1xf32>
    %40 = arith.mulf %32, %32 : vector<8x1xf32>
    %41 = arith.mulf %29, %15 : f32
    %42 = arith.divf %41, %30 : f32
    %43 = vector.broadcast %42 : f32 to vector<8x1xf32>
    %44 = arith.mulf %40, %43 : vector<8x1xf32>
    %45 = arith.addf %39, %44 : vector<8x1xf32>
    %c0_19 = arith.constant 0 : index
    %c0_20 = arith.constant 0 : index
    %46 = vector.load %arg9[%c0_19, %c0_20] : memref<8x1xf32, #tpu.memory_space<vmem>>, vector<8x1xf32>
    tpu.vector_store %arg9[%c0_19, %c0_20], %45 {strides = array<i32>} : memref<8x1xf32, #tpu.memory_space<vmem>>, vector<8x1xf32>,
    %c0_i32_21 = arith.constant 0 : i32
    %47 = arith.cmpi eq, %arg2, %c0_i32_21 : i32
    %48 = arith.extui %47 : i1 to i32
    %c0_i32_22 = arith.constant 0 : i32
    %49 = arith.cmpi ne, %48, %c0_i32_22 : i32
    scf.if %49 {
      %c0_23 = arith.constant 0 : index
      %c0_24 = arith.constant 0 : index
      %50 = vector.load %arg9[%c0_23, %c0_24] : memref<8x1xf32, #tpu.memory_space<vmem>>, vector<8x1xf32>
      %cst_25 = arith.constant 1.562500e-02 : f32
      %51 = vector.broadcast %cst_25 : f32 to vector<8x1xf32>
      %52 = arith.mulf %50, %51 : vector<8x1xf32>
      %cst_26 = arith.constant 9.99999974E-6 : f32
      %53 = vector.broadcast %cst_26 : f32 to vector<8x1xf32>
      %54 = arith.addf %52, %53 : vector<8x1xf32>
      %55 = math.rsqrt %54 : vector<8x1xf32>
      %56 = arith.mulf %55, %55 : vector<8x1xf32>
      %57 = arith.mulf %52, %56 : vector<8x1xf32>
      %cst_27 = arith.constant 9.99999974E-6 : f32
      %58 = vector.broadcast %cst_27 : f32 to vector<8x1xf32>
      %59 = arith.addf %57, %58 : vector<8x1xf32>
      %60 = math.rsqrt %59 : vector<8x1xf32>
      %61 = arith.mulf %55, %60 : vector<8x1xf32>
      %c0_28 = arith.constant 0 : index
      %c0_29 = arith.constant 0 : index
      %62 = vector.load %arg8[%c0_28, %c0_29] : memref<8x1xf32, #tpu.memory_space<vmem>>, vector<8x1xf32>
      %c0_30 = arith.constant 0 : index
      %c0_31 = arith.constant 0 : index
      %c0_32 = arith.constant 0 : index
      %63 = vector.load %arg6[%c0_30, %c0_31, %c0_32] : memref<1x8x1xf32, #tpu.memory_space<vmem>>, vector<1x8x1xf32>
      %64 = vector.shape_cast %63 : vector<1x8x1xf32> to vector<8x1xf32>
      %65 = vector.shape_cast %62 : vector<8x1xf32> to vector<1x8x1xf32>
      tpu.vector_store %arg6[%c0_30, %c0_31, %c0_32], %65 {strides = array<i32>} : memref<1x8x1xf32, #tpu.memory_space<vmem>>, vector<1x8x1xf32>,
      %c0_33 = arith.constant 0 : index
      %c0_34 = arith.constant 0 : index
      %c0_35 = arith.constant 0 : index
      %66 = vector.load %arg7[%c0_33, %c0_34, %c0_35] : memref<1x8x1xf32, #tpu.memory_space<vmem>>, vector<1x8x1xf32>
      %67 = vector.shape_cast %66 : vector<1x8x1xf32> to vector<8x1xf32>
      %68 = vector.shape_cast %61 : vector<8x1xf32> to vector<1x8x1xf32>
      tpu.vector_store %arg7[%c0_33, %c0_34, %c0_35], %68 {strides = array<i32>} : memref<1x8x1xf32, #tpu.memory_space<vmem>>, vector<1x8x1xf32>,
    } else {
    }
    return
  }
  func.func @transform_0(%arg0: i32, %arg1: i32, %arg2: i32) -> (i32, i32, i32) {
    %c0_i32 = arith.constant 0 : i32
    %c0_i32_0 = arith.constant 0 : i32
    return %arg0, %c0_i32, %arg2 : i32, i32, i32
  }
  func.func @transform_1(%arg0: i32, %arg1: i32, %arg2: i32) -> (i32, i32) {
    %c0_i32 = arith.constant 0 : i32
    %c0_i32_0 = arith.constant 0 : i32
    return %arg1, %c0_i32 : i32, i32
  }
  func.func @transform_2(%arg0: i32, %arg1: i32, %arg2: i32) -> (i32, i32, i32) {
    %c0_i32 = arith.constant 0 : i32
    return %arg0, %arg1, %arg2 : i32, i32, i32
  }
  func.func @transform_3(%arg0: i32, %arg1: i32, %arg2: i32) -> (i32, i32, i32) {
    %c0_i32 = arith.constant 0 : i32
    %c0_i32_0 = arith.constant 0 : i32
    return %arg0, %arg1, %c0_i32 : i32, i32, i32
  }
  func.func @transform_4(%arg0: i32, %arg1: i32, %arg2: i32) -> (i32, i32, i32) {
    %c0_i32 = arith.constant 0 : i32
    %c0_i32_0 = arith.constant 0 : i32
    return %arg0, %arg1, %c0_i32 : i32, i32, i32
  }
}

module attributes {stable_mosaic.version = 11 : i64} {
  func.func @_norm_act_kernel(%arg0: i32, %arg1: i32, %arg2: i32, %arg3: memref<1x8x128xf32, #tpu.memory_space<vmem>>, %arg4: memref<1x8x1xf32, #tpu.memory_space<vmem>>, %arg5: memref<1x8x1xf32, #tpu.memory_space<vmem>>, %arg6: memref<1x8x128xf32, #tpu.memory_space<vmem>>) attributes {dimension_semantics = [#tpu.dimension_semantics<parallel>, #tpu.dimension_semantics<parallel>, #tpu.dimension_semantics<parallel>], iteration_bounds = array<i64: 2, 1, 1>, scalar_prefetch = 0 : i64, scratch_operands = 0 : i64, tpu.core_type = #tpu.core_type<tc>, window_params = [{transform_indices = @transform_0, window_bounds = array<i64: 1, 8, 128>}, {transform_indices = @transform_1, window_bounds = array<i64: 1, 8, 1>}, {transform_indices = @transform_2, window_bounds = array<i64: 1, 8, 1>}, {transform_indices = @transform_3, window_bounds = array<i64: 1, 8, 128>}]} {
    %c0 = arith.constant 0 : index
    %c0_0 = arith.constant 0 : index
    %c0_1 = arith.constant 0 : index
    %0 = vector.load %arg3[%c0, %c0_0, %c0_1] : memref<1x8x128xf32, #tpu.memory_space<vmem>>, vector<1x8x128xf32>
    %1 = vector.shape_cast %0 : vector<1x8x128xf32> to vector<8x128xf32>
    %c0_2 = arith.constant 0 : index
    %c0_3 = arith.constant 0 : index
    %c0_4 = arith.constant 0 : index
    %2 = vector.load %arg4[%c0_2, %c0_3, %c0_4] : memref<1x8x1xf32, #tpu.memory_space<vmem>>, vector<1x8x1xf32>
    %3 = vector.shape_cast %2 : vector<1x8x1xf32> to vector<8x1xf32>
    %4 = vector.broadcast %3 : vector<8x1xf32> to vector<8x128xf32>
    %5 = arith.subf %1, %4 : vector<8x128xf32>
    %c0_5 = arith.constant 0 : index
    %c0_6 = arith.constant 0 : index
    %c0_7 = arith.constant 0 : index
    %6 = vector.load %arg5[%c0_5, %c0_6, %c0_7] : memref<1x8x1xf32, #tpu.memory_space<vmem>>, vector<1x8x1xf32>
    %7 = vector.shape_cast %6 : vector<1x8x1xf32> to vector<8x1xf32>
    %8 = vector.broadcast %7 : vector<8x1xf32> to vector<8x128xf32>
    %9 = arith.mulf %5, %8 : vector<8x128xf32>
    %cst = arith.constant 0.000000e+00 : f32
    %10 = vector.broadcast %cst : f32 to vector<8x128xf32>
    %11 = arith.cmpf oge, %9, %10 : vector<8x128xf32>
    %cst_8 = arith.constant 2.000000e-01 : f32
    %12 = vector.broadcast %cst_8 : f32 to vector<8x128xf32>
    %13 = arith.mulf %12, %9 : vector<8x128xf32>
    %14 = arith.select %11, %9, %13 : vector<8x128xi1>, vector<8x128xf32>
    %c0_9 = arith.constant 0 : index
    %c0_10 = arith.constant 0 : index
    %c0_11 = arith.constant 0 : index
    %15 = vector.load %arg6[%c0_9, %c0_10, %c0_11] : memref<1x8x128xf32, #tpu.memory_space<vmem>>, vector<1x8x128xf32>
    %16 = vector.shape_cast %15 : vector<1x8x128xf32> to vector<8x128xf32>
    %17 = vector.shape_cast %14 : vector<8x128xf32> to vector<1x8x128xf32>
    tpu.vector_store %arg6[%c0_9, %c0_10, %c0_11], %17 {strides = array<i32>} : memref<1x8x128xf32, #tpu.memory_space<vmem>>, vector<1x8x128xf32>,
    return
  }
  func.func @transform_0(%arg0: i32, %arg1: i32, %arg2: i32) -> (i32, i32, i32) {
    %c0_i32 = arith.constant 0 : i32
    return %arg0, %arg1, %arg2 : i32, i32, i32
  }
  func.func @transform_1(%arg0: i32, %arg1: i32, %arg2: i32) -> (i32, i32, i32) {
    %c0_i32 = arith.constant 0 : i32
    %c0_i32_0 = arith.constant 0 : i32
    return %arg0, %arg1, %c0_i32 : i32, i32, i32
  }
  func.func @transform_2(%arg0: i32, %arg1: i32, %arg2: i32) -> (i32, i32, i32) {
    %c0_i32 = arith.constant 0 : i32
    %c0_i32_0 = arith.constant 0 : i32
    return %arg0, %arg1, %c0_i32 : i32, i32, i32
  }
  func.func @transform_3(%arg0: i32, %arg1: i32, %arg2: i32) -> (i32, i32, i32) {
    %c0_i32 = arith.constant 0 : i32
    return %arg0, %arg1, %arg2 : i32, i32, i32
  }
}

</mosaic_0001>

<bundles_post_ra>
// kernel: down_forward.3
= control target key start
LH: loop header
LB: loop body
LE: loop exit
PB: predicated region body
PF: predicated region fallthrough
CT: control target
= control target key end

     0   :  { %s500_s12 = smov 0   ;;  %s502_s13 = smov 0   ;;  %s536_s0 = inlined_call_operand.vmem [shape: f32[2,8,128], index: 0, kind: input, shape index: {}, may-alias: {0,3}]   ;;  %s537_s1 = inlined_call_operand.vmem [shape: f32[2,8,1], index: 1, kind: input, shape index: {}]   ;;  %s538_s2 = inlined_call_operand.vmem [shape: f32[2,8,1], index: 2, kind: input, shape index: {}]   ;;  %s539_s3 = inlined_call_operand.vmem [shape: f32[2,8,128], index: 3, kind: output, shape index: {}, may-alias: {0,3}]  }
   0x1   :  { %s504_s14 = smov 0  }
   0x2 LB: > { %s32_s15 = sadd.s32 1, %s473_s13  ;;  %p422_p0 = scmp.ge.s32.totalorder %s477_s14, 1  ;;  %s477_s14 = sphi %s504_s14, %s13_s14   ;;  %s473_s13 = sphi %s502_s13, %s541_s13   ;;  %s469_s12 = sphi %s500_s12, %s540_s12  }
   0x3   : > { %p34_p1 = scmp.ge.s32.totalorder %s32_s15, 2  ;;  %p197_p2 = scmp.lt.s32.totalorder %s477_s14, 3 }
   0x5   : > { %s543_s15 = smov (%p34_p1, %s32_s15), 0  ;;  %p198_p3 = pnand %p422_p0, %p197_p2 }
   0x6   : > { %p245_p4 = scmp.lt.s32.totalorder (!%p198_p3), %s469_s12, 1  ;;  %v479_v0 = vmov (!%p198_p3), 0  }
   0x7   : > { %201 = sbr.rel (%p198_p3) target bundleno = 156 (0x9c), region = 32  ;;  %454 = vset.pattern.permute.xlu0 (!%p198_p3), %v479_v0 }
   0xe   : > { %s545_s12 = smov (!%p245_p4, %s469_s12), 1 }
   0xf   : > { %s423_s16 = sshll.u32 %s545_s12, 3 }
  0x10   : > { %s261_s19 = scalar_lea.vmem %s537_s1, %s423_s16  ;;  %s268_s22 = scalar_lea.vmem %s538_s2, %s423_s16 }
  0x11   : > { %v280_v1 = vld [vmem:[%s261_s19] sm:$0xff]  ;;  %s254_s25 = scalar_lea.vmem %s536_s0, %s423_s16  ;;  %s278_s28 = scalar_lea.vmem %s539_s3, %s423_s16 }
  0x12   : > { %283 = vperm.xlu0 %454, %v280_v1   ;;  %v287_v2 = vld [vmem:[%s268_s22] sm:$0xff] }
  0x13   : > { %v279_v4 = vld [vmem:[%s254_s25] sm:$0xff] }
  0x16   : > { %290 = vperm.xlu0 %454, %v287_v2  }
  0x91   : > { %v284_v3 = vpop.permute.xlu0 %283 }
  0x92   : > { %v286_v5 = vsub.f32 %v279_v4, %v284_v3 }
  0x95   : > { %v291_v6 = vpop.permute.xlu0 %290 }
  0x96   : > { %v293_v7 = vmul.f32 %v291_v6, %v286_v5 }
  0x98   : > { %vm294_vm0 = vcmp.ge.f32.partialorder %v293_v7, 0.0  ;;  %v295_v8 = vmul.f32 0.2, %v293_v7 }
  0x9a   : > { %v296_v9 = vsel %vm294_vm0, %v293_v7, %v295_v8 }
  0x9b   : > { %297 = vst [vmem:[%s278_s28] sm:$0xff] %v296_v9 }
  0x9c PF: > { %s13_s14 = sadd.s32 1, %s477_s14   ;;  %s540_s12 = smov %s473_s13 }
  0x9d   : > { %p10_p5 = scmp.ge.s32.totalorder %s13_s14, 4   ;;  %s541_s13 = smov %s543_s15 }
  0x9f   :  { %12 = sbr.rel (!%p10_p5) target bundleno = 2 (0x2), region = 68 }

// kernel: down_forward.2
= control target key start
LH: loop header
LB: loop body
LE: loop exit
PB: predicated region body
PF: predicated region fallthrough
CT: control target
= control target key end

     0   :  { %s772_s15 = smov 0   ;;  %s774_s16 = smov 0   ;;  %s825_s0 = inlined_call_operand.vmem [shape: f32[2,64,128], index: 0, kind: input, shape index: {}]   ;;  %s826_s1 = inlined_call_operand.vmem [shape: f32[8,64], index: 1, kind: input, shape index: {}]   ;;  %s827_s2 = inlined_call_operand.vmem [shape: f32[2,8,128], index: 2, kind: output, shape index: {0}]   ;;  %s828_s3 = inlined_call_operand.vmem [shape: f32[2,8,1], index: 3, kind: output, shape index: {1}]   ;;  %s829_s4 = inlined_call_operand.vmem [shape: f32[2,8,1], index: 4, kind: output, shape index: {2}]  }
   0x1   :  { %s776_s17 = smov 0  }
   0x2 LB: > { %s34_s18 = sadd.s32 1, %s738_s16  ;;  %p639_p0 = scmp.ge.s32.totalorder %s742_s17, 1  ;;  %s742_s17 = sphi %s776_s17, %s15_s17   ;;  %s738_s16 = sphi %s774_s16, %s831_s16   ;;  %s734_s15 = sphi %s772_s15, %s830_s15  }
   0x3   : > { %p36_p1 = scmp.ge.s32.totalorder %s34_s18, 2  ;;  %p208_p2 = scmp.lt.s32.totalorder %s742_s17, 3 }
   0x5   : > { %s833_s18 = smov (%p36_p1, %s34_s18), 0  ;;  %p209_p3 = pnand %p639_p0, %p208_p2 }
   0x6   : > { %p260_p4 = scmp.lt.s32.totalorder (!%p209_p3), %s734_s15, 1  ;;  %vm300_vm0 = vcmask (!%p209_p3), 7168   ;;  %v744_v0 = vmov (!%p209_p3), 0.0|0.0   ;;  %v745_v1 = vmov (!%p209_p3), 0.0   ;;  %vm746_vm1 = vmmov (!%p209_p3), 0   ;;  %v311_v14 = vld [vmem:[%s826_s1] sm:$0xff] (!%p209_p3) }
   0x7   : > { %212 = sbr.rel (%p209_p3) target bundleno = 585 (0x249), region = 28  ;;  %677 = vmatprep.subr.bf16.mxu0 (!%p209_p3), %v744_v0  ;;  %301 = vst.msk [vmem:[#allocation2] sm:$0xff] (!%p209_p3), %vm300_vm0, %v745_v1  ;;  %302 = vst.msk [vmem:[#allocation3] sm:$0xff] (!%p209_p3), %vm300_vm0, %v745_v1  ;;  %674 = vmatprep.mubr.msk.f32.mxu0 (!%p209_p3), %vm746_vm1, %v745_v1  ;;  %vm312_vm2 = vcmask (!%p209_p3), 523264   ;;  %v397_v17 = vlaneseq (!%p209_p3) }
   0x9   : > { %v398_v18 = vand.u32 (!%p209_p3), 127, %v397_v17 }
   0xb   : > { %vm400_vm3 = vcmp.lt.s32.totalorder (!%p209_p3), %v398_v18, 64 }
   0xe   : > { %s835_s15 = smov (!%p260_p4, %s734_s15), 1  ;;  %v408_v19 = vld [vmem:[#allocation2] sm:$0xff]  ;;  %v419_v29 = vld [vmem:[#allocation3] sm:$0xff] }
   0xf   : > { %s648_s19 = sshll.u32 %s835_s15, 6  ;;  %s798_s25 = sshll.u32 %s835_s15, 3 }
  0x10   : > { %s267_s22 = scalar_lea.vmem %s825_s0, %s648_s19  ;;  %s281_s28 = scalar_lea.vmem %s827_s2, %s798_s25 }
  0x11   : > { %v303_v2 = vld [vmem:[%s267_s22] sm:$0xff]  ;;  %v304_v3 = vld [vmem:[%s267_s22 + $0x8] sm:$0xff]  ;;  %v305_v4 = vld [vmem:[%s267_s22 + $0x10] sm:$0xff]  ;;  %s288_s5 = scalar_lea.vmem %s828_s3, %s798_s25  ;;  %s295_s8 = scalar_lea.vmem %s829_s4, %s798_s25 }
  0x12   : > { %v678_v5 = vpack.c.bf16 %v304_v3, %v303_v2  ;;  %v306_v6 = vld [vmem:[%s267_s22 + $0x18] sm:$0xff]  ;;  %v307_v8 = vld [vmem:[%s267_s22 + $0x20] sm:$0xff]  ;;  %v308_v9 = vld [vmem:[%s267_s22 + $0x28] sm:$0xff] }
  0x13   : > { %v681_v7 = vpack.c.bf16 %v306_v6, %v305_v4  ;;  %v684_v10 = vpack.c.bf16 %v308_v9, %v307_v8  ;;  %v309_v11 = vld [vmem:[%s267_s22 + $0x30] sm:$0xff]  ;;  %v310_v12 = vld [vmem:[%s267_s22 + $0x38] sm:$0xff] }
  0x14   : > { %679 = vmatpush3.bf16.msra.mxu0 %v678_v5  ;;  %v687_v13 = vpack.c.bf16 %v310_v12, %v309_v11 }
  0x15   : > { %680 = vmatprep.subr.bf16.mxu0 %v744_v0 }
  0x18   : > { %682 = vmatpush3.bf16.msra.mxu0 %v681_v7 }
  0x19   : > { %683 = vmatprep.subr.bf16.mxu0 %v744_v0 }
  0x1c   : > { %685 = vmatpush3.bf16.msra.mxu0 %v684_v10 }
  0x1d   : > { %686 = vmatprep.subr.bf16.mxu0 %v744_v0 }
  0x20   : > { %688 = vmatpush3.bf16.msra.mxu0 %v687_v13 }
  0x23   : > { %675 = vmatmul.mubr.msk.f32.vlgmr.msra.gmra.mrb[0].mxu0 %vm312_vm2, %v311_v14 }
  0xf6   : > { %v382_v15 = vpop.f32.mrb[0].mxu0 }
  0xf7   : > { %386 = vst [vmem:[%s281_s28] sm:$0xff] %v382_v15  ;;  %387 = vadd.xlane.f32.xlu0 %v382_v15  ;;  %v676_v16 = vpop.f32.mrb[1].mxu0 }
 0x184   : > { %v388_v20 = vpop.xlane.xlu0 %387 }
 0x185   : > { %v396_v21 = vmul.f32 0.015625, %v388_v20 }
 0x187   : > { %v401_v22 = vsub.f32 %v382_v15, %v396_v21  ;;  %v409_v23 = vsub.f32 %v396_v21, %v408_v19 }
 0x189   : > { %v416_v24 = vadd.f32 %v409_v23, %v408_v19  ;;  %v402_v25 = vsel %vm400_vm3, %v401_v22, 0.0  ;;  %v421_v28 = vmul.f32 %v409_v23, %v409_v23 }
 0x18a   : > { %v403_v26 = vmul.f32 %v402_v25, %v402_v25 }
 0x18b   : > { %418 = vst.msk [vmem:[#allocation2] sm:$0xff] %vm300_vm0, %v416_v24  ;;  %v428_v31 = vmul.f32 0.0, %v421_v28 }
 0x18c   : > { %404 = vadd.xlane.f32.xlu0 %v403_v26 }
 0x192   : > { %v443_v27 = vld [vmem:[#allocation2] sm:$0xff] }
 0x193   : > { %444 = vst.msk [vmem:[%s288_s5] sm:$0xff] %vm300_vm0, %v443_v27 }
 0x219   : > { %v405_v30 = vpop.xlane.xlu0 %404 }
 0x21a   : > { %v420_v32 = vadd.f32 %v419_v29, %v405_v30 }
 0x21c   : > { %v429_v33 = vadd.f32 %v428_v31, %v420_v32 }
 0x21e   : > { %430 = vst.msk [vmem:[#allocation3] sm:$0xff] %vm300_vm0, %v429_v33 }
 0x225   : > { %v434_v34 = vld [vmem:[#allocation3] sm:$0xff] }
 0x226   : > { %v435_v35 = vmul.f32 0.015625, %v434_v34 }
 0x228   : > { %v436_v36 = vadd.f32 1e-05, %v435_v35 }
 0x22a   : > { %716 = vrsqrt.f32 %v436_v36 }
 0x234   : > { %v717_v37 = vpop.eup %716 }
 0x235   : > { %v438_v38 = vmul.f32 %v717_v37, %v717_v37 }
 0x237   : > { %v439_v39 = vmul.f32 %v438_v38, %v435_v35 }
 0x239   : > { %v440_v40 = vadd.f32 1e-05, %v439_v39 }
 0x23b   : > { %718 = vrsqrt.f32 %v440_v40 }
 0x245   : > { %v719_v41 = vpop.eup %718 }
 0x246   : > { %v442_v42 = vmul.f32 %v719_v41, %v717_v37 }
 0x248   : > { %445 = vst.msk [vmem:[%s295_s8] sm:$0xff] %vm300_vm0, %v442_v42 }
 0x249 PF: > { %s15_s17 = sadd.s32 1, %s742_s17   ;;  %s830_s15 = smov %s738_s16 }
 0x24a   : > { %p12_p5 = scmp.ge.s32.totalorder %s15_s17, 4   ;;  %s831_s16 = smov %s833_s18 }
 0x24c   :  { %14 = sbr.rel (!%p12_p5) target bundleno = 2 (0x2), region = 93 }

</bundles_post_ra>
